<compile_context>
chip_gen: v6e
topology: v6e:2x2x1
jax: 0.10.0
libtpu: 0.0.40
codegen_flags: <defaults>
</compile_context>

<pallas_src>
import math

import jax
import jax.numpy as jnp
from jax.experimental import pallas as pl
from jax.experimental.pallas import tpu as pltpu

SCALING_FACTOR = 0.18215


# ----------------------------- Pallas kernels ------------------------------

def _dec_head_kernel(z_ref, a3_ref, wdi_ref, ws1_ref, bdi_ref, wu1_ref, bu1_ref, o_ref):
    """Decoder conv_in + skip_conv_1 (gamma=1) at 4x4, token-major.

    dec_conv_in_w already includes the 1/scaling_factor of VAE_decode.forward.
    The next stage's 1x1 conv (dec_u1) is applied here at low resolution.
    """
    d = (jnp.dot(z_ref[0], wdi_ref[...], preferred_element_type=jnp.float32)
         + jnp.dot(a3_ref[0], ws1_ref[...], preferred_element_type=jnp.float32)
         + bdi_ref[...])
    d = d * jax.nn.sigmoid(d)                                         # (16, 64)
    e = jnp.dot(d, wu1_ref[...], preferred_element_type=jnp.float32) + bu1_ref[...]
    o_ref[0] = e.astype(o_ref.dtype)                                  # (16, 32)


def _dec_mid_kernel(up_ref, skip_ref, ws_ref, wn_ref, bn_ref, o_ref):
    """Channel-first decoder up-block: d = silu(up + Ws @ skip); e = Wn @ d + bn."""
    d = up_ref[0] + jnp.dot(ws_ref[...], skip_ref[0], preferred_element_type=jnp.float32)
    d = d * jax.nn.sigmoid(d)
    e = jnp.dot(wn_ref[...], d, preferred_element_type=jnp.float32) + bn_ref[...]
    o_ref[0] = e.astype(o_ref.dtype)


def _dec_out_kernel(up_ref, skip_ref, ws_ref, wo_ref, bo_ref, o_ref):
    """Final decoder stage: skip_conv_4 + conv_out + clamp(-1, 1).

    Output is written channel-first (3, H*W) -> lane-dense NCHW slab; the wrapper
    only needs a free reshape (no transpose, no narrow masked stores).
    """
    d = up_ref[0] + jnp.dot(ws_ref[...], skip_ref[0], preferred_element_type=jnp.float32)
    d = d * jax.nn.sigmoid(d)
    y = jnp.dot(wo_ref[...], d, preferred_element_type=jnp.float32) + bo_ref[...]
    o_ref[0] = jnp.clip(y, -1.0, 1.0).astype(o_ref.dtype)


# ----------------------------- Pallas wrappers ------------------------------

def _batch_spec(shape):
    rest = len(shape) - 1
    return pl.BlockSpec((1,) + tuple(shape[1:]),
                        lambda b, rest=rest: (b,) + (0,) * rest)


def _shared_spec(shape):
    rank = len(shape)
    return pl.BlockSpec(tuple(shape), lambda b, rank=rank: (0,) * rank)


def _run_batched(kernel, batch_inputs, shared_inputs, out_shape):
    """Launch `kernel` with grid=(B,) ("parallel" -> both v7x TensorCores).

    batch_inputs: arrays with a leading batch dim, blocked as (1, ...).
    shared_inputs: weights, passed whole to every grid step.
    All blocks equal the full trailing array dims, so no (8,128) tiling issues.
    """
    batch = batch_inputs[0].shape[0]
    in_specs = ([_batch_spec(a.shape) for a in batch_inputs]
                + [_shared_spec(a.shape) for a in shared_inputs])
    fn = pl.pallas_call(
        kernel,
        out_shape=jax.ShapeDtypeStruct(tuple(out_shape), jnp.float32),
        grid=(batch,),
        in_specs=in_specs,
        out_specs=_batch_spec(tuple(out_shape)),
        compiler_params=pltpu.CompilerParams(dimension_semantics=("parallel",)),
    )
    return fn(*batch_inputs, *shared_inputs)


# --------------------------- XLA-level layout glue ---------------------------

def _upsample2_cf(x, h, w):
    """Nearest-neighbour 2x upsample, channel-first flattened-spatial layout."""
    bsz, c, _ = x.shape
    x = x.reshape(bsz, c, h, w)
    x = jnp.repeat(jnp.repeat(x, 2, axis=2), 2, axis=3)
    return x.reshape(bsz, c, 4 * h * w)


def _upsample2_tm_to_cf(x, h, w):
    """(B, h*w, C) token-major -> (B, C, (2h)*(2w)) channel-first upsample."""
    bsz, _, c = x.shape
    x = jnp.transpose(x, (0, 2, 1)).reshape(bsz, c, h, w)
    x = jnp.repeat(jnp.repeat(x, 2, axis=2), 2, axis=3)
    return x.reshape(bsz, c, 4 * h * w)


# ----------------------------- module forward ------------------------------

def _vae_decode(p, x_latent_nchw, skips):
    """decode(x / scaling_factor) with incoming encoder skip acts, clamp(-1, 1)."""
    bsz, cz, hz, wz = x_latent_nchw.shape                 # (B, 4, 4, 4)
    a0, a1, a2, a3 = skips                                # gamma = 1 skip acts
    # latent NCHW -> token-major (B, 16, 4): tiny transpose at the lowest res
    z_tm = jnp.transpose(x_latent_nchw.reshape(bsz, cz, hz * wz), (0, 2, 1))

    e1 = _run_batched(_dec_head_kernel, [z_tm, a3],
                      [p["dec_conv_in_w"], p["skip1_w"], p["dec_conv_in_b"],
                       p["dec_u1_w"], p["dec_u1_b"]], (bsz, 16, 32))
    e2 = _run_batched(_dec_mid_kernel, [_upsample2_tm_to_cf(e1, hz, wz), a2],
                      [p["skip2_w"], p["dec_u2_w"], p["dec_u2_b"]], (bsz, 16, 64))
    e3 = _run_batched(_dec_mid_kernel, [_upsample2_cf(e2, 2 * hz, 2 * wz), a1],
                      [p["skip3_w"], p["dec_u3_w"], p["dec_u3_b"]], (bsz, 16, 256))
    y = _run_batched(_dec_out_kernel, [_upsample2_cf(e3, 4 * hz, 4 * wz), a0],
                     [p["skip4_w"], p["dec_conv_out_w"], p["dec_conv_out_b"]],
                     (bsz, 3, 1024))
    return y.reshape(bsz, 3, 8 * hz, 8 * wz)              # channel-first -> NCHW (free)


def vae_decode_forward(params, x, skips, direction="a2b"):
    """VAE_decode.forward(x, direction)."""
    assert direction in ["a2b", "b2a"]
    p = params[direction]                                  # self.vae vs self.vae_b2a
    return _vae_decode(p, x, skips)


# ----------------------------- parameter init ------------------------------

def init_params(key):
    # Channel-first stages store W as (Cout, Cin), b as (Cout, 1);
    # token-major (4x4) stage stores W as (Cin, Cout), b as (1, Cout).
    specs = [
        ("dec_conv_in_w", (4, 64)), ("dec_conv_in_b", (1, 64)),
        ("skip1_w", (64, 64)),
        ("dec_u1_w", (64, 32)), ("dec_u1_b", (1, 32)),
        ("skip2_w", (32, 64)),
        ("dec_u2_w", (16, 32)), ("dec_u2_b", (16, 1)),
        ("skip3_w", (16, 32)),
        ("dec_u3_w", (16, 16)), ("dec_u3_b", (16, 1)),
        ("skip4_w", (16, 16)),
        ("dec_conv_out_w", (3, 16)), ("dec_conv_out_b", (3, 1)),
    ]
    keys = jax.random.split(key, len(specs))
    p = {}
    for (name, shape), k in zip(specs, keys):
        if name.endswith("_b"):
            p[name] = jnp.zeros(shape, jnp.float32)
        else:
            p[name] = (0.05 * jax.random.normal(k, shape)).astype(jnp.float32)
    # One-time constant fold: decode(x / scaling_factor) -> fold 1/SF into conv_in.
    p["dec_conv_in_w"] = p["dec_conv_in_w"] / SCALING_FACTOR
    return p


# ----------------------------------- main -----------------------------------

if __name__ == "__main__":
    key = jax.random.PRNGKey(0)
    kz, k0, k1, k2, k3 = jax.random.split(key, 5)

    # Latent x (B, 4, 4, 4) and encoder.current_down_blocks (skip activations) at
    # 32x32 / 16x16 / 8x8 (channel-first) and 4x4 (token-major) resolutions.
    x = jax.random.normal(kz, (2, 4, 4, 4), jnp.float32)
    skips = [
        jax.random.normal(k0, (2, 16, 1024), jnp.float32),   # 32x32, 16 ch
        jax.random.normal(k1, (2, 32, 256), jnp.float32),    # 16x16, 32 ch
        jax.random.normal(k2, (2, 64, 64), jnp.float32),     #  8x8,  64 ch
        jax.random.normal(k3, (2, 16, 64), jnp.float32),     #  4x4,  64 ch (token-major)
    ]
    params = {
        "a2b": init_params(jax.random.PRNGKey(42)),
        "b2a": init_params(jax.random.PRNGKey(43)),
    }

    fwd = jax.jit(vae_decode_forward, static_argnames=("direction",))
    out = fwd(params, x, skips, direction="a2b")
    out = jax.block_until_ready(out)

    assert out.shape == (2, 3, 32, 32)
    assert float(jnp.max(jnp.abs(out))) <= 1.0 + 1e-6     # clamp(-1, 1)
    print("KERNEL_OK")
</pallas_src>

<mosaic_0001>
module attributes {stable_mosaic.version = 11 : i64} {
  func.func @_dec_head_kernel(%arg0: i32, %arg1: memref<1x16x4xf32, #tpu.memory_space<vmem>>, %arg2: memref<1x16x64xf32, #tpu.memory_space<vmem>>, %arg3: memref<4x64xf32, #tpu.memory_space<vmem>>, %arg4: memref<64x64xf32, #tpu.memory_space<vmem>>, %arg5: memref<1x64xf32, #tpu.memory_space<vmem>>, %arg6: memref<64x32xf32, #tpu.memory_space<vmem>>, %arg7: memref<1x32xf32, #tpu.memory_space<vmem>>, %arg8: memref<1x16x32xf32, #tpu.memory_space<vmem>>) attributes {dimension_semantics = [#tpu.dimension_semantics<parallel>], iteration_bounds = array<i64: 2>, scalar_prefetch = 0 : i64, scratch_operands = 0 : i64, tpu.core_type = #tpu.core_type<tc>, window_params = [{transform_indices = @transform_0, window_bounds = array<i64: 1, 16, 4>}, {transform_indices = @transform_1, window_bounds = array<i64: 1, 16, 64>}, {pipeline_mode = #tpu.pipeline_mode<synchronous>, transform_indices = @transform_2, window_bounds = array<i64: 4, 64>}, {pipeline_mode = #tpu.pipeline_mode<synchronous>, transform_indices = @transform_3, window_bounds = array<i64: 64, 64>}, {pipeline_mode = #tpu.pipeline_mode<synchronous>, transform_indices = @transform_4, window_bounds = array<i64: 1, 64>}, {pipeline_mode = #tpu.pipeline_mode<synchronous>, transform_indices = @transform_5, window_bounds = array<i64: 64, 32>}, {pipeline_mode = #tpu.pipeline_mode<synchronous>, transform_indices = @transform_6, window_bounds = array<i64: 1, 32>}, {transform_indices = @transform_7, window_bounds = array<i64: 1, 16, 32>}]} {
    %c0 = arith.constant 0 : index
    %c0_0 = arith.constant 0 : index
    %c0_1 = arith.constant 0 : index
    %0 = vector.load %arg1[%c0, %c0_0, %c0_1] : memref<1x16x4xf32, #tpu.memory_space<vmem>>, vector<1x16x4xf32>
    %1 = vector.shape_cast %0 : vector<1x16x4xf32> to vector<16x4xf32>
    %c0_2 = arith.constant 0 : index
    %c0_3 = arith.constant 0 : index
    %2 = vector.load %arg3[%c0_2, %c0_3] : memref<4x64xf32, #tpu.memory_space<vmem>>, vector<4x64xf32>
    %cst = arith.constant dense<0.000000e+00> : vector<16x64xf32>
    %3 = tpu.matmul %1, %2, %cst {dimension_numbers = #tpu.dot_dimension_numbers<[1], [0], [0], [1], [0, 0, 1, 1], [], []>} : vector<16x4xf32>, vector<4x64xf32>, vector<16x64xf32> -> vector<16x64xf32>
    %c0_4 = arith.constant 0 : index
    %c0_5 = arith.constant 0 : index
    %c0_6 = arith.constant 0 : index
    %4 = vector.load %arg2[%c0_4, %c0_5, %c0_6] : memref<1x16x64xf32, #tpu.memory_space<vmem>>, vector<1x16x64xf32>
    %5 = vector.shape_cast %4 : vector<1x16x64xf32> to vector<16x64xf32>
    %c0_7 = arith.constant 0 : index
    %c0_8 = arith.constant 0 : index
    %6 = vector.load %arg4[%c0_7, %c0_8] : memref<64x64xf32, #tpu.memory_space<vmem>>, vector<64x64xf32>
    %cst_9 = arith.constant dense<0.000000e+00> : vector<16x64xf32>
    %7 = tpu.matmul %5, %6, %cst_9 {dimension_numbers = #tpu.dot_dimension_numbers<[1], [0], [0], [1], [0, 0, 1, 1], [], []>} : vector<16x64xf32>, vector<64x64xf32>, vector<16x64xf32> -> vector<16x64xf32>
    %8 = arith.addf %3, %7 : vector<16x64xf32>
    %c0_10 = arith.constant 0 : index
    %c0_11 = arith.constant 0 : index
    %9 = vector.load %arg5[%c0_10, %c0_11] : memref<1x64xf32, #tpu.memory_space<vmem>>, vector<1x64xf32>
    %10 = vector.broadcast %9 : vector<1x64xf32> to vector<16x64xf32>
    %11 = arith.addf %8, %10 : vector<16x64xf32>
    %12 = arith.negf %11 : vector<16x64xf32>
    %13 = math.exp %12 : vector<16x64xf32>
    %cst_12 = arith.constant 1.000000e+00 : f32
    %14 = vector.broadcast %cst_12 : f32 to vector<16x64xf32>
    %15 = arith.addf %14, %13 : vector<16x64xf32>
    %16 = arith.divf %14, %15 : vector<16x64xf32>
    %17 = arith.mulf %11, %16 : vector<16x64xf32>
    %c0_13 = arith.constant 0 : index
    %c0_14 = arith.constant 0 : index
    %18 = vector.load %arg6[%c0_13, %c0_14] : memref<64x32xf32, #tpu.memory_space<vmem>>, vector<64x32xf32>
    %cst_15 = arith.constant dense<0.000000e+00> : vector<16x32xf32>
    %19 = tpu.matmul %17, %18, %cst_15 {dimension_numbers = #tpu.dot_dimension_numbers<[1], [0], [0], [1], [0, 0, 1, 1], [], []>} : vector<16x64xf32>, vector<64x32xf32>, vector<16x32xf32> -> vector<16x32xf32>
    %c0_16 = arith.constant 0 : index
    %c0_17 = arith.constant 0 : index
    %20 = vector.load %arg7[%c0_16, %c0_17] : memref<1x32xf32, #tpu.memory_space<vmem>>, vector<1x32xf32>
    %21 = vector.broadcast %20 : vector<1x32xf32> to vector<16x32xf32>
    %22 = arith.addf %19, %21 : vector<16x32xf32>
    %c0_18 = arith.constant 0 : index
    %c0_19 = arith.constant 0 : index
    %c0_20 = arith.constant 0 : index
    %23 = vector.load %arg8[%c0_18, %c0_19, %c0_20] : memref<1x16x32xf32, #tpu.memory_space<vmem>>, vector<1x16x32xf32>
    %24 = vector.shape_cast %23 : vector<1x16x32xf32> to vector<16x32xf32>
    %25 = vector.shape_cast %22 : vector<16x32xf32> to vector<1x16x32xf32>
    tpu.vector_store %arg8[%c0_18, %c0_19, %c0_20], %25 {strides = array<i32>} : memref<1x16x32xf32, #tpu.memory_space<vmem>>, vector<1x16x32xf32>,
    return
  }
  func.func @transform_0(%arg0: i32) -> (i32, i32, i32) {
    %c0_i32 = arith.constant 0 : i32
    %c0_i32_0 = arith.constant 0 : i32
    %c0_i32_1 = arith.constant 0 : i32
    return %arg0, %c0_i32, %c0_i32_0 : i32, i32, i32
  }
  func.func @transform_1(%arg0: i32) -> (i32, i32, i32) {
    %c0_i32 = arith.constant 0 : i32
    %c0_i32_0 = arith.constant 0 : i32
    %c0_i32_1 = arith.constant 0 : i32
    return %arg0, %c0_i32, %c0_i32_0 : i32, i32, i32
  }
  func.func @transform_2(%arg0: i32) -> (i32, i32) {
    %c0_i32 = arith.constant 0 : i32
    %c0_i32_0 = arith.constant 0 : i32
    %c0_i32_1 = arith.constant 0 : i32
    return %c0_i32, %c0_i32_0 : i32, i32
  }
  func.func @transform_3(%arg0: i32) -> (i32, i32) {
    %c0_i32 = arith.constant 0 : i32
    %c0_i32_0 = arith.constant 0 : i32
    %c0_i32_1 = arith.constant 0 : i32
    return %c0_i32, %c0_i32_0 : i32, i32
  }
  func.func @transform_4(%arg0: i32) -> (i32, i32) {
    %c0_i32 = arith.constant 0 : i32
    %c0_i32_0 = arith.constant 0 : i32
    %c0_i32_1 = arith.constant 0 : i32
    return %c0_i32, %c0_i32_0 : i32, i32
  }
  func.func @transform_5(%arg0: i32) -> (i32, i32) {
    %c0_i32 = arith.constant 0 : i32
    %c0_i32_0 = arith.constant 0 : i32
    %c0_i32_1 = arith.constant 0 : i32
    return %c0_i32, %c0_i32_0 : i32, i32
  }
  func.func @transform_6(%arg0: i32) -> (i32, i32) {
    %c0_i32 = arith.constant 0 : i32
    %c0_i32_0 = arith.constant 0 : i32
    %c0_i32_1 = arith.constant 0 : i32
    return %c0_i32, %c0_i32_0 : i32, i32
  }
  func.func @transform_7(%arg0: i32) -> (i32, i32, i32) {
    %c0_i32 = arith.constant 0 : i32
    %c0_i32_0 = arith.constant 0 : i32
    %c0_i32_1 = arith.constant 0 : i32
    return %arg0, %c0_i32, %c0_i32_0 : i32, i32, i32
  }
}

module attributes {stable_mosaic.version = 11 : i64} {
  func.func @_dec_mid_kernel(%arg0: i32, %arg1: memref<1x32x64xf32, #tpu.memory_space<vmem>>, %arg2: memref<1x64x64xf32, #tpu.memory_space<vmem>>, %arg3: memref<32x64xf32, #tpu.memory_space<vmem>>, %arg4: memref<16x32xf32, #tpu.memory_space<vmem>>, %arg5: memref<16x1xf32, #tpu.memory_space<vmem>>, %arg6: memref<1x16x64xf32, #tpu.memory_space<vmem>>) attributes {dimension_semantics = [#tpu.dimension_semantics<parallel>], iteration_bounds = array<i64: 2>, scalar_prefetch = 0 : i64, scratch_operands = 0 : i64, tpu.core_type = #tpu.core_type<tc>, window_params = [{transform_indices = @transform_0, window_bounds = array<i64: 1, 32, 64>}, {transform_indices = @transform_1, window_bounds = array<i64: 1, 64, 64>}, {pipeline_mode = #tpu.pipeline_mode<synchronous>, transform_indices = @transform_2, window_bounds = array<i64: 32, 64>}, {pipeline_mode = #tpu.pipeline_mode<synchronous>, transform_indices = @transform_3, window_bounds = array<i64: 16, 32>}, {pipeline_mode = #tpu.pipeline_mode<synchronous>, transform_indices = @transform_4, window_bounds = array<i64: 16, 1>}, {transform_indices = @transform_5, window_bounds = array<i64: 1, 16, 64>}]} {
    %c0 = arith.constant 0 : index
    %c0_0 = arith.constant 0 : index
    %c0_1 = arith.constant 0 : index
    %0 = vector.load %arg1[%c0, %c0_0, %c0_1] : memref<1x32x64xf32, #tpu.memory_space<vmem>>, vector<1x32x64xf32>
    %1 = vector.shape_cast %0 : vector<1x32x64xf32> to vector<32x64xf32>
    %c0_2 = arith.constant 0 : index
    %c0_3 = arith.constant 0 : index
    %2 = vector.load %arg3[%c0_2, %c0_3] : memref<32x64xf32, #tpu.memory_space<vmem>>, vector<32x64xf32>
    %c0_4 = arith.constant 0 : index
    %c0_5 = arith.constant 0 : index
    %c0_6 = arith.constant 0 : index
    %3 = vector.load %arg2[%c0_4, %c0_5, %c0_6] : memref<1x64x64xf32, #tpu.memory_space<vmem>>, vector<1x64x64xf32>
    %4 = vector.shape_cast %3 : vector<1x64x64xf32> to vector<64x64xf32>
    %cst = arith.constant dense<0.000000e+00> : vector<32x64xf32>
    %5 = tpu.matmul %2, %4, %cst {dimension_numbers = #tpu.dot_dimension_numbers<[1], [0], [0], [1], [0, 0, 1, 1], [], []>} : vector<32x64xf32>, vector<64x64xf32>, vector<32x64xf32> -> vector<32x64xf32>
    %6 = arith.addf %1, %5 : vector<32x64xf32>
    %7 = arith.negf %6 : vector<32x64xf32>
    %8 = math.exp %7 : vector<32x64xf32>
    %cst_7 = arith.constant 1.000000e+00 : f32
    %9 = vector.broadcast %cst_7 : f32 to vector<32x64xf32>
    %10 = arith.addf %9, %8 : vector<32x64xf32>
    %11 = arith.divf %9, %10 : vector<32x64xf32>
    %12 = arith.mulf %6, %11 : vector<32x64xf32>
    %c0_8 = arith.constant 0 : index
    %c0_9 = arith.constant 0 : index
    %13 = vector.load %arg4[%c0_8, %c0_9] : memref<16x32xf32, #tpu.memory_space<vmem>>, vector<16x32xf32>
    %cst_10 = arith.constant dense<0.000000e+00> : vector<16x64xf32>
    %14 = tpu.matmul %13, %12, %cst_10 {dimension_numbers = #tpu.dot_dimension_numbers<[1], [0], [0], [1], [0, 0, 1, 1], [], []>} : vector<16x32xf32>, vector<32x64xf32>, vector<16x64xf32> -> vector<16x64xf32>
    %c0_11 = arith.constant 0 : index
    %c0_12 = arith.constant 0 : index
    %15 = vector.load %arg5[%c0_11, %c0_12] : memref<16x1xf32, #tpu.memory_space<vmem>>, vector<16x1xf32>
    %16 = vector.broadcast %15 : vector<16x1xf32> to vector<16x64xf32>
    %17 = arith.addf %14, %16 : vector<16x64xf32>
    %c0_13 = arith.constant 0 : index
    %c0_14 = arith.constant 0 : index
    %c0_15 = arith.constant 0 : index
    %18 = vector.load %arg6[%c0_13, %c0_14, %c0_15] : memref<1x16x64xf32, #tpu.memory_space<vmem>>, vector<1x16x64xf32>
    %19 = vector.shape_cast %18 : vector<1x16x64xf32> to vector<16x64xf32>
    %20 = vector.shape_cast %17 : vector<16x64xf32> to vector<1x16x64xf32>
    tpu.vector_store %arg6[%c0_13, %c0_14, %c0_15], %20 {strides = array<i32>} : memref<1x16x64xf32, #tpu.memory_space<vmem>>, vector<1x16x64xf32>,
    return
  }
  func.func @transform_0(%arg0: i32) -> (i32, i32, i32) {
    %c0_i32 = arith.constant 0 : i32
    %c0_i32_0 = arith.constant 0 : i32
    %c0_i32_1 = arith.constant 0 : i32
    return %arg0, %c0_i32, %c0_i32_0 : i32, i32, i32
  }
  func.func @transform_1(%arg0: i32) -> (i32, i32, i32) {
    %c0_i32 = arith.constant 0 : i32
    %c0_i32_0 = arith.constant 0 : i32
    %c0_i32_1 = arith.constant 0 : i32
    return %arg0, %c0_i32, %c0_i32_0 : i32, i32, i32
  }
  func.func @transform_2(%arg0: i32) -> (i32, i32) {
    %c0_i32 = arith.constant 0 : i32
    %c0_i32_0 = arith.constant 0 : i32
    %c0_i32_1 = arith.constant 0 : i32
    return %c0_i32, %c0_i32_0 : i32, i32
  }
  func.func @transform_3(%arg0: i32) -> (i32, i32) {
    %c0_i32 = arith.constant 0 : i32
    %c0_i32_0 = arith.constant 0 : i32
    %c0_i32_1 = arith.constant 0 : i32
    return %c0_i32, %c0_i32_0 : i32, i32
  }
  func.func @transform_4(%arg0: i32) -> (i32, i32) {
    %c0_i32 = arith.constant 0 : i32
    %c0_i32_0 = arith.constant 0 : i32
    %c0_i32_1 = arith.constant 0 : i32
    return %c0_i32, %c0_i32_0 : i32, i32
  }
  func.func @transform_5(%arg0: i32) -> (i32, i32, i32) {
    %c0_i32 = arith.constant 0 : i32
    %c0_i32_0 = arith.constant 0 : i32
    %c0_i32_1 = arith.constant 0 : i32
    return %arg0, %c0_i32, %c0_i32_0 : i32, i32, i32
  }
}

module attributes {stable_mosaic.version = 11 : i64} {
  func.func @_dec_mid_kernel(%arg0: i32, %arg1: memref<1x16x256xf32, #tpu.memory_space<vmem>>, %arg2: memref<1x32x256xf32, #tpu.memory_space<vmem>>, %arg3: memref<16x32xf32, #tpu.memory_space<vmem>>, %arg4: memref<16x16xf32, #tpu.memory_space<vmem>>, %arg5: memref<16x1xf32, #tpu.memory_space<vmem>>, %arg6: memref<1x16x256xf32, #tpu.memory_space<vmem>>) attributes {dimension_semantics = [#tpu.dimension_semantics<parallel>], iteration_bounds = array<i64: 2>, scalar_prefetch = 0 : i64, scratch_operands = 0 : i64, tpu.core_type = #tpu.core_type<tc>, window_params = [{transform_indices = @transform_0, window_bounds = array<i64: 1, 16, 256>}, {transform_indices = @transform_1, window_bounds = array<i64: 1, 32, 256>}, {pipeline_mode = #tpu.pipeline_mode<synchronous>, transform_indices = @transform_2, window_bounds = array<i64: 16, 32>}, {pipeline_mode = #tpu.pipeline_mode<synchronous>, transform_indices = @transform_3, window_bounds = array<i64: 16, 16>}, {pipeline_mode = #tpu.pipeline_mode<synchronous>, transform_indices = @transform_4, window_bounds = array<i64: 16, 1>}, {transform_indices = @transform_5, window_bounds = array<i64: 1, 16, 256>}]} {
    %c0 = arith.constant 0 : index
    %c0_0 = arith.constant 0 : index
    %c0_1 = arith.constant 0 : index
    %0 = vector.load %arg1[%c0, %c0_0, %c0_1] : memref<1x16x256xf32, #tpu.memory_space<vmem>>, vector<1x16x256xf32>
    %1 = vector.shape_cast %0 : vector<1x16x256xf32> to vector<16x256xf32>
    %c0_2 = arith.constant 0 : index
    %c0_3 = arith.constant 0 : index
    %2 = vector.load %arg3[%c0_2, %c0_3] : memref<16x32xf32, #tpu.memory_space<vmem>>, vector<16x32xf32>
    %c0_4 = arith.constant 0 : index
    %c0_5 = arith.constant 0 : index
    %c0_6 = arith.constant 0 : index
    %3 = vector.load %arg2[%c0_4, %c0_5, %c0_6] : memref<1x32x256xf32, #tpu.memory_space<vmem>>, vector<1x32x256xf32>
    %4 = vector.shape_cast %3 : vector<1x32x256xf32> to vector<32x256xf32>
    %cst = arith.constant dense<0.000000e+00> : vector<16x256xf32>
    %5 = tpu.matmul %2, %4, %cst {dimension_numbers = #tpu.dot_dimension_numbers<[1], [0], [0], [1], [0, 0, 1, 1], [], []>} : vector<16x32xf32>, vector<32x256xf32>, vector<16x256xf32> -> vector<16x256xf32>
    %6 = arith.addf %1, %5 : vector<16x256xf32>
    %7 = arith.negf %6 : vector<16x256xf32>
    %8 = math.exp %7 : vector<16x256xf32>
    %cst_7 = arith.constant 1.000000e+00 : f32
    %9 = vector.broadcast %cst_7 : f32 to vector<16x256xf32>
    %10 = arith.addf %9, %8 : vector<16x256xf32>
    %11 = arith.divf %9, %10 : vector<16x256xf32>
    %12 = arith.mulf %6, %11 : vector<16x256xf32>
    %c0_8 = arith.constant 0 : index
    %c0_9 = arith.constant 0 : index
    %13 = vector.load %arg4[%c0_8, %c0_9] : memref<16x16xf32, #tpu.memory_space<vmem>>, vector<16x16xf32>
    %cst_10 = arith.constant dense<0.000000e+00> : vector<16x256xf32>
    %14 = tpu.matmul %13, %12, %cst_10 {dimension_numbers = #tpu.dot_dimension_numbers<[1], [0], [0], [1], [0, 0, 1, 1], [], []>} : vector<16x16xf32>, vector<16x256xf32>, vector<16x256xf32> -> vector<16x256xf32>
    %c0_11 = arith.constant 0 : index
    %c0_12 = arith.constant 0 : index
    %15 = vector.load %arg5[%c0_11, %c0_12] : memref<16x1xf32, #tpu.memory_space<vmem>>, vector<16x1xf32>
    %16 = vector.broadcast %15 : vector<16x1xf32> to vector<16x256xf32>
    %17 = arith.addf %14, %16 : vector<16x256xf32>
    %c0_13 = arith.constant 0 : index
    %c0_14 = arith.constant 0 : index
    %c0_15 = arith.constant 0 : index
    %18 = vector.load %arg6[%c0_13, %c0_14, %c0_15] : memref<1x16x256xf32, #tpu.memory_space<vmem>>, vector<1x16x256xf32>
    %19 = vector.shape_cast %18 : vector<1x16x256xf32> to vector<16x256xf32>
    %20 = vector.shape_cast %17 : vector<16x256xf32> to vector<1x16x256xf32>
    tpu.vector_store %arg6[%c0_13, %c0_14, %c0_15], %20 {strides = array<i32>} : memref<1x16x256xf32, #tpu.memory_space<vmem>>, vector<1x16x256xf32>,
    return
  }
  func.func @transform_0(%arg0: i32) -> (i32, i32, i32) {
    %c0_i32 = arith.constant 0 : i32
    %c0_i32_0 = arith.constant 0 : i32
    %c0_i32_1 = arith.constant 0 : i32
    return %arg0, %c0_i32, %c0_i32_0 : i32, i32, i32
  }
  func.func @transform_1(%arg0: i32) -> (i32, i32, i32) {
    %c0_i32 = arith.constant 0 : i32
    %c0_i32_0 = arith.constant 0 : i32
    %c0_i32_1 = arith.constant 0 : i32
    return %arg0, %c0_i32, %c0_i32_0 : i32, i32, i32
  }
  func.func @transform_2(%arg0: i32) -> (i32, i32) {
    %c0_i32 = arith.constant 0 : i32
    %c0_i32_0 = arith.constant 0 : i32
    %c0_i32_1 = arith.constant 0 : i32
    return %c0_i32, %c0_i32_0 : i32, i32
  }
  func.func @transform_3(%arg0: i32) -> (i32, i32) {
    %c0_i32 = arith.constant 0 : i32
    %c0_i32_0 = arith.constant 0 : i32
    %c0_i32_1 = arith.constant 0 : i32
    return %c0_i32, %c0_i32_0 : i32, i32
  }
  func.func @transform_4(%arg0: i32) -> (i32, i32) {
    %c0_i32 = arith.constant 0 : i32
    %c0_i32_0 = arith.constant 0 : i32
    %c0_i32_1 = arith.constant 0 : i32
    return %c0_i32, %c0_i32_0 : i32, i32
  }
  func.func @transform_5(%arg0: i32) -> (i32, i32, i32) {
    %c0_i32 = arith.constant 0 : i32
    %c0_i32_0 = arith.constant 0 : i32
    %c0_i32_1 = arith.constant 0 : i32
    return %arg0, %c0_i32, %c0_i32_0 : i32, i32, i32
  }
}

module attributes {stable_mosaic.version = 11 : i64} {
  func.func @_dec_out_kernel(%arg0: i32, %arg1: memref<1x16x1024xf32, #tpu.memory_space<vmem>>, %arg2: memref<1x16x1024xf32, #tpu.memory_space<vmem>>, %arg3: memref<16x16xf32, #tpu.memory_space<vmem>>, %arg4: memref<3x16xf32, #tpu.memory_space<vmem>>, %arg5: memref<3x1xf32, #tpu.memory_space<vmem>>, %arg6: memref<1x3x1024xf32, #tpu.memory_space<vmem>>) attributes {dimension_semantics = [#tpu.dimension_semantics<parallel>], iteration_bounds = array<i64: 2>, scalar_prefetch = 0 : i64, scratch_operands = 0 : i64, tpu.core_type = #tpu.core_type<tc>, window_params = [{transform_indices = @transform_0, window_bounds = array<i64: 1, 16, 1024>}, {transform_indices = @transform_1, window_bounds = array<i64: 1, 16, 1024>}, {pipeline_mode = #tpu.pipeline_mode<synchronous>, transform_indices = @transform_2, window_bounds = array<i64: 16, 16>}, {pipeline_mode = #tpu.pipeline_mode<synchronous>, transform_indices = @transform_3, window_bounds = array<i64: 3, 16>}, {pipeline_mode = #tpu.pipeline_mode<synchronous>, transform_indices = @transform_4, window_bounds = array<i64: 3, 1>}, {transform_indices = @transform_5, window_bounds = array<i64: 1, 3, 1024>}]} {
    %c0 = arith.constant 0 : index
    %c0_0 = arith.constant 0 : index
    %c0_1 = arith.constant 0 : index
    %0 = vector.load %arg1[%c0, %c0_0, %c0_1] : memref<1x16x1024xf32, #tpu.memory_space<vmem>>, vector<1x16x1024xf32>
    %1 = vector.shape_cast %0 : vector<1x16x1024xf32> to vector<16x1024xf32>
    %c0_2 = arith.constant 0 : index
    %c0_3 = arith.constant 0 : index
    %2 = vector.load %arg3[%c0_2, %c0_3] : memref<16x16xf32, #tpu.memory_space<vmem>>, vector<16x16xf32>
    %c0_4 = arith.constant 0 : index
    %c0_5 = arith.constant 0 : index
    %c0_6 = arith.constant 0 : index
    %3 = vector.load %arg2[%c0_4, %c0_5, %c0_6] : memref<1x16x1024xf32, #tpu.memory_space<vmem>>, vector<1x16x1024xf32>
    %4 = vector.shape_cast %3 : vector<1x16x1024xf32> to vector<16x1024xf32>
    %cst = arith.constant dense<0.000000e+00> : vector<16x1024xf32>
    %5 = tpu.matmul %2, %4, %cst {dimension_numbers = #tpu.dot_dimension_numbers<[1], [0], [0], [1], [0, 0, 1, 1], [], []>} : vector<16x16xf32>, vector<16x1024xf32>, vector<16x1024xf32> -> vector<16x1024xf32>
    %6 = arith.addf %1, %5 : vector<16x1024xf32>
    %7 = arith.negf %6 : vector<16x1024xf32>
    %8 = math.exp %7 : vector<16x1024xf32>
    %cst_7 = arith.constant 1.000000e+00 : f32
    %9 = vector.broadcast %cst_7 : f32 to vector<16x1024xf32>
    %10 = arith.addf %9, %8 : vector<16x1024xf32>
    %11 = arith.divf %9, %10 : vector<16x1024xf32>
    %12 = arith.mulf %6, %11 : vector<16x1024xf32>
    %c0_8 = arith.constant 0 : index
    %c0_9 = arith.constant 0 : index
    %13 = vector.load %arg4[%c0_8, %c0_9] : memref<3x16xf32, #tpu.memory_space<vmem>>, vector<3x16xf32>
    %cst_10 = arith.constant dense<0.000000e+00> : vector<3x1024xf32>
    %14 = tpu.matmul %13, %12, %cst_10 {dimension_numbers = #tpu.dot_dimension_numbers<[1], [0], [0], [1], [0, 0, 1, 1], [], []>} : vector<3x16xf32>, vector<16x1024xf32>, vector<3x1024xf32> -> vector<3x1024xf32>
    %c0_11 = arith.constant 0 : index
    %c0_12 = arith.constant 0 : index
    %15 = vector.load %arg5[%c0_11, %c0_12] : memref<3x1xf32, #tpu.memory_space<vmem>>, vector<3x1xf32>
    %16 = vector.broadcast %15 : vector<3x1xf32> to vector<3x1024xf32>
    %17 = arith.addf %14, %16 : vector<3x1024xf32>
    %cst_13 = arith.constant -1.000000e+00 : f32
    %cst_14 = arith.constant 1.000000e+00 : f32
    %18 = vector.broadcast %cst_13 : f32 to vector<3x1024xf32>
    %19 = arith.maximumf %18, %17 : vector<3x1024xf32>
    %20 = vector.broadcast %cst_14 : f32 to vector<3x1024xf32>
    %21 = arith.minimumf %20, %19 : vector<3x1024xf32>
    %c0_15 = arith.constant 0 : index
    %c0_16 = arith.constant 0 : index
    %c0_17 = arith.constant 0 : index
    %22 = vector.load %arg6[%c0_15, %c0_16, %c0_17] : memref<1x3x1024xf32, #tpu.memory_space<vmem>>, vector<1x3x1024xf32>
    %23 = vector.shape_cast %22 : vector<1x3x1024xf32> to vector<3x1024xf32>
    %24 = vector.shape_cast %21 : vector<3x1024xf32> to vector<1x3x1024xf32>
    tpu.vector_store %arg6[%c0_15, %c0_16, %c0_17], %24 {strides = array<i32>} : memref<1x3x1024xf32, #tpu.memory_space<vmem>>, vector<1x3x1024xf32>,
    return
  }
  func.func @transform_0(%arg0: i32) -> (i32, i32, i32) {
    %c0_i32 = arith.constant 0 : i32
    %c0_i32_0 = arith.constant 0 : i32
    %c0_i32_1 = arith.constant 0 : i32
    return %arg0, %c0_i32, %c0_i32_0 : i32, i32, i32
  }
  func.func @transform_1(%arg0: i32) -> (i32, i32, i32) {
    %c0_i32 = arith.constant 0 : i32
    %c0_i32_0 = arith.constant 0 : i32
    %c0_i32_1 = arith.constant 0 : i32
    return %arg0, %c0_i32, %c0_i32_0 : i32, i32, i32
  }
  func.func @transform_2(%arg0: i32) -> (i32, i32) {
    %c0_i32 = arith.constant 0 : i32
    %c0_i32_0 = arith.constant 0 : i32
    %c0_i32_1 = arith.constant 0 : i32
    return %c0_i32, %c0_i32_0 : i32, i32
  }
  func.func @transform_3(%arg0: i32) -> (i32, i32) {
    %c0_i32 = arith.constant 0 : i32
    %c0_i32_0 = arith.constant 0 : i32
    %c0_i32_1 = arith.constant 0 : i32
    return %c0_i32, %c0_i32_0 : i32, i32
  }
  func.func @transform_4(%arg0: i32) -> (i32, i32) {
    %c0_i32 = arith.constant 0 : i32
    %c0_i32_0 = arith.constant 0 : i32
    %c0_i32_1 = arith.constant 0 : i32
    return %c0_i32, %c0_i32_0 : i32, i32
  }
  func.func @transform_5(%arg0: i32) -> (i32, i32, i32) {
    %c0_i32 = arith.constant 0 : i32
    %c0_i32_0 = arith.constant 0 : i32
    %c0_i32_1 = arith.constant 0 : i32
    return %arg0, %c0_i32, %c0_i32_0 : i32, i32, i32
  }
}

</mosaic_0001>

<bundles_post_ra>
// kernel: vae_decode_forward.4
= control target key start
LH: loop header
LB: loop body
LE: loop exit
PB: predicated region body
PF: predicated region fallthrough
CT: control target
= control target key end

     0   :  { %s826_s24 = smov 0   ;;  %s912_s0 = inlined_call_operand.vmem [shape: f32[2,16,4], index: 0, kind: input, shape index: {}]   ;;  %s913_s1 = inlined_call_operand.vmem [shape: f32[2,16,64], index: 1, kind: input, shape index: {}]   ;;  %s914_s2 = inlined_call_operand.vmem [shape: f32[4,64], index: 2, kind: input, shape index: {}]   ;;  %s915_s3 = inlined_call_operand.vmem [shape: f32[64,64], index: 3, kind: input, shape index: {}]   ;;  %s916_s4 = inlined_call_operand.vmem [shape: f32[1,64], index: 4, kind: input, shape index: {}]   ;;  %s917_s5 = inlined_call_operand.vmem [shape: f32[64,32], index: 5, kind: input, shape index: {}]   ;;  %s918_s6 = inlined_call_operand.vmem [shape: f32[1,32], index: 6, kind: input, shape index: {}]   ;;  %s919_s7 = inlined_call_operand.vmem [shape: f32[2,16,32], index: 7, kind: output, shape index: {}]  }
   0x1 LB: > { %s669_s25 = sadd.s32 4294967295, %s784_s24   ;;  %p673_p0 = scmp.ge.s32.totalorder %s784_s24, 1  ;;  %s784_s24 = sphi %s826_s24, %s17_s24  }
   0x2   : > { %p247_p1 = scmp.lt.s32.totalorder %s784_s24, 3 }
   0x4   : > { %p248_p2 = pnand %p673_p0, %p247_p1 }
   0x5   : > { %p284_p3 = scmp.lt.s32.totalorder (!%p248_p2), %s669_s25, 1 }
   0x6   : > { %251 = sbr.rel (%p248_p2) target bundleno = 460 (0x1cc), region = 48 }
   0xb   : > { %v311_v0 = vld [vmem:[%s915_s3 + $0x38] sm:$0xff]  ;;  %v310_v1 = vld [vmem:[%s915_s3 + $0x30] sm:$0xff]  ;;  %vm401_vm0 = vcmask 1043456   ;;  %v309_v2 = vld [vmem:[%s915_s3 + $0x28] sm:$0xff]  ;;  %s921_s25 = smov (!%p284_p3, %s669_s25), 1  ;;  %vm394_vm1 = vcmask 31744  }
   0xc   : > { %719 = vmatprep.subr.mxu0 %v311_v0  ;;  %v301_v3 = vld [vmem:[%s914_s2] sm:$0xf]  ;;  %s849_s13 = sshll.u32 %s921_s25, 4  ;;  %v307_v5 = vld [vmem:[%s915_s3 + $0x18] sm:$0xff]  ;;  %vm312_vm2 = vcmask 523264   ;;  %v306_v9 = vld [vmem:[%s915_s3 + $0x10] sm:$0xff] }
   0xd   : > { %720 = vmatpush3.msra.mxu0 %v311_v0  ;;  %738 = vmatprep.subr.msk.mxu1 %vm401_vm0, %v301_v3  ;;  %v308_v4 = vld [vmem:[%s915_s3 + $0x20] sm:$0xff]  ;;  %s288_s16 = scalar_lea.vmem %s912_s0, %s849_s13  ;;  %s293_s21 = scalar_lea.vmem %s913_s1, %s849_s13  ;;  %v305_v10 = vld [vmem:[%s915_s3 + $0x8] sm:$0xff]  ;;  %v510_v13 = vld [vmem:[%s917_s5 + $0x38] sm:$0xff]  ;;  %vm599_vm3 = vcmask 261120  }
   0xe   : > { %721 = vmatprep.subr.mxu0 %v310_v1  ;;  %739 = vmatpush3.msk.msra.mxu1 %vm401_vm0, %v301_v3  ;;  %v299_v6 = vld [vmem:[%s288_s16] sm:$0xff]  ;;  %v300_v7 = vld [vmem:[%s288_s16 + $0x8] sm:$0xff]  ;;  %v509_v14 = vld [vmem:[%s917_s5 + $0x30] sm:$0xff]  ;;  %s298_s30 = scalar_lea.vmem %s919_s7, %s849_s13 }
   0xf   : > { %722 = vmatpush3.msra.mxu0 %v310_v1  ;;  %740 = vmatprep.mubr.msk.f32.mxu1 %vm394_vm1, %v299_v6  ;;  %v302_v8 = vld [vmem:[%s293_s21] sm:$0xff]  ;;  %v303_v12 = vld [vmem:[%s293_s21 + $0x8] sm:$0xff]  ;;  %v506_v17 = vld [vmem:[%s917_s5 + $0x18] sm:$0xff] }
  0x10   : > { %723 = vmatprep.subr.mxu0 %v309_v2  ;;  %741 = vmatmul.mubr.msk.f32.vlgmr.msra.gmra.mxu1 %vm394_vm1, %v300_v7  ;;  %v304_v11 = vld [vmem:[%s915_s3] sm:$0xff]  ;;  %v508_v15 = vld [vmem:[%s917_s5 + $0x28] sm:$0xff]  ;;  %v505_v18 = vld [vmem:[%s917_s5 + $0x10] sm:$0xff] }
  0x11   : > { %724 = vmatpush3.msra.mxu0 %v309_v2  ;;  %735 = vmatprep.mubr.msk.f32.mxu0 %vm312_vm2, %v302_v8  ;;  %v507_v16 = vld [vmem:[%s917_s5 + $0x20] sm:$0xff]  ;;  %v504_v19 = vld [vmem:[%s917_s5 + $0x8] sm:$0xff] }
  0x12   : > { %725 = vmatprep.subr.mxu0 %v308_v4  ;;  %743 = vmatprep.subr.mxu1 %v510_v13  ;;  %v503_v20 = vld [vmem:[%s917_s5] sm:$0xff] }
  0x13   : > { %726 = vmatpush3.msra.mxu0 %v308_v4  ;;  %744 = vmatpush3.msra.mxu1 %v510_v13  ;;  %v685_v23 = vld [vmem:[%s916_s4] ss:$0 sm:$0xff] }
  0x14   : > { %727 = vmatprep.subr.mxu0 %v307_v5  ;;  %745 = vmatprep.subr.mxu1 %v509_v14  ;;  %v688_v40 = vld [vmem:[%s918_s6] ss:$0 sm:$0xff] }
  0x15   : > { %728 = vmatpush3.msra.mxu0 %v307_v5  ;;  %746 = vmatpush3.msra.mxu1 %v509_v14 }
  0x16   : > { %729 = vmatprep.subr.mxu0 %v306_v9  ;;  %747 = vmatprep.subr.mxu1 %v508_v15 }
  0x17   : > { %730 = vmatpush3.msra.mxu0 %v306_v9  ;;  %748 = vmatpush3.msra.mxu1 %v508_v15 }
  0x18   : > { %731 = vmatprep.subr.mxu0 %v305_v10  ;;  %749 = vmatprep.subr.mxu1 %v507_v16 }
  0x19   : > { %732 = vmatpush3.msra.mxu0 %v305_v10  ;;  %750 = vmatpush3.msra.mxu1 %v507_v16 }
  0x1a   : > { %733 = vmatprep.subr.mxu0 %v304_v11  ;;  %751 = vmatprep.subr.mxu1 %v506_v17 }
  0x1b   : > { %734 = vmatpush3.msra.mxu0 %v304_v11  ;;  %752 = vmatpush3.msra.mxu1 %v506_v17 }
  0x1c   : > { %736 = vmatmul.mubr.msk.f32.vlgmr.msra.gmra.mxu0 %vm312_vm2, %v303_v12  ;;  %753 = vmatprep.subr.mxu1 %v505_v18 }
  0x1d   : > { %754 = vmatpush3.msra.mxu1 %v505_v18 }
  0x1e   : > { %755 = vmatprep.subr.mxu1 %v504_v19 }
  0x1f   : > { %756 = vmatpush3.msra.mxu1 %v504_v19 }
  0x20   : > { %757 = vmatprep.subr.mxu1 %v503_v20 }
  0x21   : > { %758 = vmatpush3.msra.mxu1 %v503_v20 }
  0xd0   : > { %v742_v21 = vpop.f32.mrf.mxu1 }
  0xd2   : > { %v471_v25 = vpop.f32.mrf.mxu1 }
  0xdc   : > { %v737_v22 = vpop.f32.mrf.mxu0 }
  0xdd   : > { %v477_v24 = vadd.f32 %v742_v21, %v737_v22 }
  0xde   : > { %v385_v26 = vpop.f32.mrf.mxu0 }
  0xdf   : > { %v488_v27 = vadd.f32 %v685_v23, %v477_v24  ;;  %v472_v28 = vadd.f32 %v471_v25, %v385_v26 }
  0xe1   : > { %v687_v29 = vmul.f32 -1.442695, %v488_v27  ;;  %v487_v30 = vadd.f32 %v685_v23, %v472_v28 }
  0xe3   : > { %770 = vpow2.f32 %v687_v29  ;;  %v686_v31 = vmul.f32 -1.442695, %v487_v30 }
  0xe5   : > { %772 = vpow2.f32 %v686_v31 }
  0xf0   : > { %v771_v32 = vpop.eup %770 }
  0xf1   : > { %v496_v33 = vadd.f32 1.0, %v771_v32 }
  0xf2   : > { %v773_v34 = vpop.eup %772 }
  0xf3   : > { %v495_v35 = vadd.f32 1.0, %v773_v34  ;;  %774 = vrcp.f32 %v496_v33 }
  0xf5   : > { %776 = vrcp.f32 %v495_v35 }
 0x100   : > { %v775_v36 = vpop.eup %774 }
 0x101   : > { %v502_v39 = vmul.f32 %v775_v36, %v488_v27 }
 0x102   : > { %v777_v37 = vpop.eup %776 }
 0x103   : > { %v501_v38 = vmul.f32 %v777_v37, %v487_v30 }
 0x105   : > { %759 = vmatprep.mubr.msk.f32.mxu1 %vm312_vm2, %v501_v38 }
 0x106   : > { %760 = vmatmul.mubr.msk.f32.vlgmr.msra.gmra.mxu1 %vm312_vm2, %v502_v39 }
 0x1c6   : > { %v761_v41 = vpop.f32.mrf.mxu1 }
 0x1c7   : > { %v596_v42 = vadd.f32 %v761_v41, %v688_v40 }
 0x1c8   : > { %v590_v43 = vpop.f32.mrf.mxu1 }
 0x1c9   : > { %601 = vst.msk [vmem:[%s298_s30 + $0x8] sm:$0xff] %vm599_vm3, %v596_v42  ;;  %v591_v44 = vadd.f32 %v688_v40, %v590_v43 }
 0x1cb   : > { %600 = vst.msk [vmem:[%s298_s30] sm:$0xff] %vm599_vm3, %v591_v44 }
 0x1cc PF: > { %s17_s24 = sadd.s32 1, %s784_s24  }
 0x1cd   : > { %p14_p4 = scmp.ge.s32.totalorder %s17_s24, 4  }
 0x1cf   :  { %16 = sbr.rel (!%p14_p4) target bundleno = 1 (0x1), region = 81 }

// kernel: vae_decode_forward.5
= control target key start
LH: loop header
LB: loop body
LE: loop exit
PB: predicated region body
PF: predicated region fallthrough
CT: control target
= control target key end

     0   :  { %s698_s18 = smov 0   ;;  %s755_s0 = inlined_call_operand.vmem [shape: f32[2,32,64], index: 0, kind: input, shape index: {}]   ;;  %s756_s1 = inlined_call_operand.vmem [shape: f32[2,64,64], index: 1, kind: input, shape index: {}]   ;;  %s757_s2 = inlined_call_operand.vmem [shape: f32[32,64], index: 2, kind: input, shape index: {}]   ;;  %s758_s3 = inlined_call_operand.vmem [shape: f32[16,32], index: 3, kind: input, shape index: {}]   ;;  %s759_s4 = inlined_call_operand.vmem [shape: f32[16,1], index: 4, kind: input, shape index: {}]   ;;  %s760_s5 = inlined_call_operand.vmem [shape: f32[2,16,64], index: 5, kind: output, shape index: {}]  }
   0x1 LB: > { %s556_s19 = sadd.s32 4294967295, %s665_s18   ;;  %p560_p0 = scmp.ge.s32.totalorder %s665_s18, 1  ;;  %s665_s18 = sphi %s698_s18, %s15_s18  }
   0x2   : > { %p197_p1 = scmp.lt.s32.totalorder %s665_s18, 3 }
   0x4   : > { %p198_p2 = pnand %p560_p0, %p197_p1 }
   0x5   : > { %p230_p3 = scmp.lt.s32.totalorder (!%p198_p2), %s556_s19, 1 }
   0x6   : > { %201 = sbr.rel (%p198_p2) target bundleno = 470 (0x1d6), region = 40 }
   0xb   : > { %v249_v0 = vld [vmem:[%s757_s2] sm:$0xff]  ;;  %vm261_vm0 = vcmask 523264   ;;  %s762_s19 = smov (!%p230_p3, %s556_s19), 1  ;;  %v250_v9 = vld [vmem:[%s757_s2 + $0x8] sm:$0xff]  ;;  %v251_v10 = vld [vmem:[%s757_s2 + $0x10] sm:$0xff]  ;;  %vm405_vm1 = vcmask 261120  }
   0xc   : > { %616 = vmatprep.mubr.msk.f32.mxu0 %vm261_vm0, %v249_v0  ;;  %s580_s22 = sshll.u32 %s762_s19, 6  ;;  %v252_v11 = vld [vmem:[%s757_s2 + $0x18] sm:$0xff]  ;;  %v391_v12 = vld [vmem:[%s758_s3] sm:$0xff]  ;;  %v667_v14 = vmov 0   ;;  %v394_v15 = vld [vmem:[%s759_s4 + $0x8] sm:$0xff]  ;;  %s579_s13 = sshll.u32 %s762_s19, 5 }
   0xd   : > { %s239_s25 = scalar_lea.vmem %s756_s1, %s580_s22  ;;  %630 = vmatprep.mubr.msk.f32.mxu1 %vm405_vm1, %v391_v12  ;;  %v393_v13 = vld [vmem:[%s759_s4] sm:$0xff]  ;;  %642 = vset.pattern.permute.xlu0 %v667_v14  ;;  %s234_s16 = scalar_lea.vmem %s755_s0, %s579_s13  ;;  %v392_v48 = vld [vmem:[%s758_s3 + $0x8] sm:$0xff] }
   0xe   : > { %v260_v1 = vld [vmem:[%s239_s25 + $0x38] sm:$0xff]  ;;  %v259_v2 = vld [vmem:[%s239_s25 + $0x30] sm:$0xff]  ;;  %v258_v3 = vld [vmem:[%s239_s25 + $0x28] sm:$0xff]  ;;  %397 = vperm.xlu0 %642, %v393_v13   ;;  %s581_s21 = sshll.u32 %s762_s19, 4 }
   0xf   : > { %600 = vmatprep.subr.mxu0 %v260_v1  ;;  %v257_v4 = vld [vmem:[%s239_s25 + $0x20] sm:$0xff]  ;;  %v256_v5 = vld [vmem:[%s239_s25 + $0x18] sm:$0xff]  ;;  %v255_v6 = vld [vmem:[%s239_s25 + $0x10] sm:$0xff]  ;;  %s244_s24 = scalar_lea.vmem %s760_s5, %s581_s21 }
  0x10   : > { %601 = vmatpush3.msra.mxu0 %v260_v1  ;;  %v254_v7 = vld [vmem:[%s239_s25 + $0x8] sm:$0xff]  ;;  %v253_v8 = vld [vmem:[%s239_s25] sm:$0xff]  ;;  %v248_v21 = vld [vmem:[%s234_s16 + $0x18] sm:$0xff] }
  0x11   : > { %602 = vmatprep.subr.mxu0 %v259_v2  ;;  %v246_v16 = vld [vmem:[%s234_s16 + $0x8] sm:$0xff]  ;;  %v245_v18 = vld [vmem:[%s234_s16] sm:$0xff]  ;;  %v247_v25 = vld [vmem:[%s234_s16 + $0x10] sm:$0xff] }
  0x12   : > { %603 = vmatpush3.msra.mxu0 %v259_v2  ;;  %402 = vperm.xlu0 %642, %v394_v15  }
  0x13   : > { %604 = vmatprep.subr.mxu0 %v258_v3 }
  0x14   : > { %605 = vmatpush3.msra.mxu0 %v258_v3 }
  0x15   : > { %606 = vmatprep.subr.mxu0 %v257_v4 }
  0x16   : > { %607 = vmatpush3.msra.mxu0 %v257_v4 }
  0x17   : > { %608 = vmatprep.subr.mxu0 %v256_v5 }
  0x18   : > { %609 = vmatpush3.msra.mxu0 %v256_v5 }
  0x19   : > { %610 = vmatprep.subr.mxu0 %v255_v6 }
  0x1a   : > { %611 = vmatpush3.msra.mxu0 %v255_v6 }
  0x1b   : > { %612 = vmatprep.subr.mxu0 %v254_v7 }
  0x1c   : > { %613 = vmatpush3.msra.mxu0 %v254_v7 }
  0x1d   : > { %614 = vmatprep.subr.mxu0 %v253_v8 }
  0x1e   : > { %615 = vmatpush3.msra.mxu0 %v253_v8 }
  0x1f   : > { %617 = vmatmul.mubr.msk.f32.vlgmr.msra.gmra.mxu0 %vm261_vm0, %v250_v9 }
  0x20   : > { %619 = vmatprep.mubr.msk.f32.mxu0 %vm261_vm0, %v251_v10 }
  0x23   : > { %620 = vmatmul.mubr.msk.f32.gmra.mxu0 %vm261_vm0, %v252_v11 }
  0x89   : > { %v398_v49 = vpop.permute.xlu0 %397 }
  0x8d   : > { %v403_v50 = vpop.permute.xlu0 %402 }
  0xdf   : > { %v618_v17 = vpop.f32.mrf.mxu0 }
  0xe0   : > { %v360_v19 = vadd.f32 %v618_v17, %v246_v16 }
  0xe1   : > { %v340_v20 = vpop.f32.mrf.mxu0 }
  0xe2   : > { %v572_v22 = vmul.f32 -1.442695, %v360_v19  ;;  %v359_v23 = vadd.f32 %v340_v20, %v245_v18 }
  0xe3   : > { %v621_v24 = vpop.f32.mrf.mxu0 }
  0xe4   : > { %v571_v26 = vmul.f32 -1.442695, %v359_v23  ;;  %v362_v27 = vadd.f32 %v621_v24, %v248_v21  ;;  %643 = vpow2.f32 %v572_v22 }
  0xe5   : > { %v350_v28 = vpop.f32.mrf.mxu0 }
  0xe6   : > { %v574_v29 = vmul.f32 -1.442695, %v362_v27  ;;  %v361_v30 = vadd.f32 %v350_v28, %v247_v25  ;;  %645 = vpow2.f32 %v571_v26 }
  0xe8   : > { %647 = vpow2.f32 %v574_v29  ;;  %v573_v31 = vmul.f32 -1.442695, %v361_v30 }
  0xea   : > { %649 = vpow2.f32 %v573_v31 }
  0xf1   : > { %v644_v32 = vpop.eup %643 }
  0xf2   : > { %v376_v35 = vadd.f32 1.0, %v644_v32 }
  0xf3   : > { %v646_v33 = vpop.eup %645 }
  0xf4   : > { %v375_v38 = vadd.f32 1.0, %v646_v33 }
  0xf5   : > { %v648_v34 = vpop.eup %647 }
  0xf6   : > { %v378_v36 = vadd.f32 1.0, %v648_v34 }
  0xf7   : > { %v650_v37 = vpop.eup %649 }
  0xf8   : > { %651 = vrcp.f32 %v378_v36  ;;  %v377_v39 = vadd.f32 1.0, %v650_v37 }
  0xf9   : > { %653 = vrcp.f32 %v376_v35 }
  0xfa   : > { %655 = vrcp.f32 %v377_v39 }
  0xfb   : > { %657 = vrcp.f32 %v375_v38 }
 0x105   : > { %v652_v40 = vpop.eup %651 }
 0x106   : > { %v654_v41 = vpop.eup %653  ;;  %v390_v42 = vmul.f32 %v652_v40, %v362_v27 }
 0x107   : > { %v656_v43 = vpop.eup %655  ;;  %v388_v46 = vmul.f32 %v654_v41, %v360_v19 }
 0x108   : > { %v389_v44 = vmul.f32 %v656_v43, %v361_v30  ;;  %622 = vmatprep.subr.mxu1 %v390_v42  ;;  %v658_v45 = vpop.eup %657 }
 0x109   : > { %623 = vmatpush3.msra.mxu1 %v390_v42  ;;  %v387_v47 = vmul.f32 %v658_v45, %v359_v23 }
 0x10a   : > { %624 = vmatprep.subr.mxu1 %v389_v44 }
 0x10b   : > { %625 = vmatpush3.msra.mxu1 %v389_v44 }
 0x10c   : > { %626 = vmatprep.subr.mxu1 %v388_v46 }
 0x10d   : > { %627 = vmatpush3.msra.mxu1 %v388_v46 }
 0x10e   : > { %628 = vmatprep.subr.mxu1 %v387_v47 }
 0x10f   : > { %629 = vmatpush3.msra.mxu1 %v387_v47 }
 0x110   : > { %631 = vmatmul.mubr.msk.f32.vlgmr.msra.gmra.mxu1 %vm405_vm1, %v392_v48 }
 0x1d0   : > { %v632_v51 = vpop.f32.mrf.mxu1 }
 0x1d1   : > { %v484_v52 = vadd.f32 %v632_v51, %v403_v50 }
 0x1d2   : > { %v478_v53 = vpop.f32.mrf.mxu1 }
 0x1d3   : > { %488 = vst.msk [vmem:[%s244_s24 + $0x8] sm:$0xff] %vm261_vm0, %v484_v52  ;;  %v479_v54 = vadd.f32 %v478_v53, %v398_v49 }
 0x1d5   : > { %487 = vst.msk [vmem:[%s244_s24] sm:$0xff] %vm261_vm0, %v479_v54 }
 0x1d6 PF: > { %s15_s18 = sadd.s32 1, %s665_s18  }
 0x1d7   : > { %p12_p4 = scmp.ge.s32.totalorder %s15_s18, 4  }
 0x1d9   :  { %14 = sbr.rel (!%p12_p4) target bundleno = 1 (0x1), region = 73 }

// kernel: vae_decode_forward.6
= control target key start
LH: loop header
LB: loop body
LE: loop exit
PB: predicated region body
PF: predicated region fallthrough
CT: control target
= control target key end

     0   :  { %s635_s18 = smov 0   ;;  %s685_s0 = inlined_call_operand.vmem [shape: f32[2,16,256], index: 0, kind: input, shape index: {}]   ;;  %s686_s1 = inlined_call_operand.vmem [shape: f32[2,32,256], index: 1, kind: input, shape index: {}]   ;;  %s687_s2 = inlined_call_operand.vmem [shape: f32[16,32], index: 2, kind: input, shape index: {}]   ;;  %s688_s3 = inlined_call_operand.vmem [shape: f32[16,16], index: 3, kind: input, shape index: {}]   ;;  %s689_s4 = inlined_call_operand.vmem [shape: f32[16,1], index: 4, kind: input, shape index: {}]   ;;  %s690_s5 = inlined_call_operand.vmem [shape: f32[2,16,256], index: 5, kind: output, shape index: {}]  }
   0x1 LB: > { %s544_s19 = sadd.s32 4294967295, %s601_s18   ;;  %p548_p0 = scmp.ge.s32.totalorder %s601_s18, 1  ;;  %s601_s18 = sphi %s635_s18, %s15_s18  }
   0x2   : > { %p197_p1 = scmp.lt.s32.totalorder %s601_s18, 3 }
   0x4   : > { %p198_p2 = pnand %p548_p0, %p197_p1 }
   0x5   : > { %p230_p3 = scmp.lt.s32.totalorder (!%p198_p2), %s544_s19, 1 }
   0x6   : > { %201 = sbr.rel (%p198_p2) target bundleno = 464 (0x1d0), region = 40 }
   0xb   : > { %v603_v0 = vmov 0.0   ;;  %s692_s19 = smov (!%p230_p3, %s544_s19), 1  ;;  %v249_v9 = vld [vmem:[%s687_s2] sm:$0xff]  ;;  %vm259_vm0 = vcmask 261120   ;;  %v250_v10 = vld [vmem:[%s687_s2 + $0x8] sm:$0xff]  ;;  %v604_v12 = vmov 0  }
   0xc   : > { %330 = vmatprep.mubr.f32.mxu0 %v603_v0  ;;  %460 = vmatprep.mubr.f32.mxu1 %v603_v0  ;;  %s566_s20 = sshll.u32 %s692_s19, 6  ;;  %v377_v11 = vld [vmem:[%s689_s4] sm:$0xff]  ;;  %v378_v13 = vld [vmem:[%s689_s4 + $0x8] sm:$0xff]  ;;  %s565_s7 = sshll.u32 %s692_s19, 5  ;;  %vm389_vm1 = vcmask 130048  }
   0xd   : > { %s239_s23 = scalar_lea.vmem %s686_s1, %s566_s20  ;;  %578 = vset.pattern.permute.xlu0 %v604_v12  ;;  %s234_s10 = scalar_lea.vmem %s685_s0, %s565_s7  ;;  %v375_v46 = vld [vmem:[%s688_s3] sm:$0xff]  ;;  %v376_v47 = vld [vmem:[%s688_s3 + $0x8] sm:$0xff] }
   0xe   : > { %v258_v1 = vld [vmem:[%s239_s23 + $0x38] sm:$0xff]  ;;  %v257_v2 = vld [vmem:[%s239_s23 + $0x30] sm:$0xff]  ;;  %v256_v3 = vld [vmem:[%s239_s23 + $0x28] sm:$0xff]  ;;  %381 = vperm.xlu0 %578, %v377_v11   ;;  %s244_s17 = scalar_lea.vmem %s690_s5, %s565_s7 }
   0xf   : > { %290 = vmatprep.subr.mxu0 %v258_v1  ;;  %v255_v4 = vld [vmem:[%s239_s23 + $0x20] sm:$0xff]  ;;  %v254_v5 = vld [vmem:[%s239_s23 + $0x18] sm:$0xff]  ;;  %v253_v6 = vld [vmem:[%s239_s23 + $0x10] sm:$0xff] }
  0x10   : > { %291 = vmatpush1.msra.mxu0 %v257_v2  ;;  %v252_v7 = vld [vmem:[%s239_s23 + $0x8] sm:$0xff]  ;;  %v251_v8 = vld [vmem:[%s239_s23] sm:$0xff]  ;;  %v247_v19 = vld [vmem:[%s234_s10 + $0x10] sm:$0xff] }
  0x11   : > { %292 = vmatprep.subr.mxu0 %v256_v3  ;;  %v245_v14 = vld [vmem:[%s234_s10] sm:$0xff]  ;;  %v246_v16 = vld [vmem:[%s234_s10 + $0x8] sm:$0xff]  ;;  %v248_v23 = vld [vmem:[%s234_s10 + $0x18] sm:$0xff] }
  0x12   : > { %293 = vmatpush1.msra.mxu0 %v255_v4  ;;  %386 = vperm.xlu0 %578, %v378_v13  }
  0x13   : > { %294 = vmatprep.subr.mxu0 %v254_v5 }
  0x14   : > { %295 = vmatpush1.msra.mxu0 %v253_v6 }
  0x15   : > { %296 = vmatprep.subr.mxu0 %v252_v7 }
  0x16   : > { %297 = vmatpush1.msra.mxu0 %v251_v8 }
  0x17   : > { %555 = vmatmul.mubr.msk.f32.vlgmr.msra.gmra.mxu0 %vm259_vm0, %v249_v9 }
  0x18   : > { %336 = vmatprep.mubr.f32.mxu0 %v603_v0 }
  0x1b   : > { %556 = vmatmul.mubr.msk.f32.gmra.mxu0 %vm259_vm0, %v250_v10 }
  0x89   : > { %v382_v48 = vpop.permute.xlu0 %381 }
  0x8d   : > { %v387_v53 = vpop.permute.xlu0 %386 }
  0xd7   : > { %v332_v15 = vpop.f32.mrf.mxu0 }
  0xd8   : > { %v343_v17 = vadd.f32 %v332_v15, %v245_v14 }
  0xd9   : > { %v334_v18 = vpop.f32.mrf.mxu0 }
  0xda   : > { %v344_v20 = vadd.f32 %v334_v18, %v246_v16  ;;  %v557_v21 = vmul.f32 -1.442695, %v343_v17 }
  0xdb   : > { %v338_v22 = vpop.f32.mrf.mxu0 }
  0xdc   : > { %v558_v24 = vmul.f32 -1.442695, %v344_v20  ;;  %v345_v25 = vadd.f32 %v338_v22, %v247_v19 }
  0xdd   : > { %v340_v26 = vpop.f32.mrf.mxu0 }
  0xde   : > { %579 = vpow2.f32 %v558_v24  ;;  %v559_v27 = vmul.f32 -1.442695, %v345_v25  ;;  %v346_v28 = vadd.f32 %v340_v26, %v248_v23 }
  0xdf   : > { %581 = vpow2.f32 %v557_v21 }
  0xe0   : > { %583 = vpow2.f32 %v559_v27  ;;  %v560_v29 = vmul.f32 -1.442695, %v346_v28 }
  0xe2   : > { %585 = vpow2.f32 %v560_v29 }
  0xeb   : > { %v580_v30 = vpop.eup %579 }
  0xec   : > { %v582_v31 = vpop.eup %581  ;;  %v360_v32 = vadd.f32 1.0, %v580_v30 }
  0xed   : > { %v584_v33 = vpop.eup %583  ;;  %v359_v36 = vadd.f32 1.0, %v582_v31 }
  0xee   : > { %v361_v34 = vadd.f32 1.0, %v584_v33  ;;  %587 = vrcp.f32 %v360_v32 }
  0xef   : > { %v586_v35 = vpop.eup %585 }
  0xf0   : > { %v362_v37 = vadd.f32 1.0, %v586_v35  ;;  %589 = vrcp.f32 %v361_v34 }
  0xf2   : > { %591 = vrcp.f32 %v362_v37 }
  0xf3   : > { %593 = vrcp.f32 %v359_v36 }
  0xfb   : > { %v588_v38 = vpop.eup %587 }
  0xfc   : > { %v372_v44 = vmul.f32 %v588_v38, %v344_v20 }
  0xfd   : > { %v590_v39 = vpop.eup %589 }
  0xfe   : > { %v373_v43 = vmul.f32 %v590_v39, %v345_v25 }
  0xff   : > { %v592_v40 = vpop.eup %591 }
 0x100   : > { %v594_v41 = vpop.eup %593  ;;  %v374_v42 = vmul.f32 %v592_v40, %v346_v28 }
 0x101   : > { %v371_v45 = vmul.f32 %v594_v41, %v343_v17 }
 0x102   : > { %424 = vmatprep.subr.mxu1 %v374_v42 }
 0x103   : > { %425 = vmatpush1.msra.mxu1 %v373_v43 }
 0x104   : > { %426 = vmatprep.subr.mxu1 %v372_v44 }
 0x105   : > { %427 = vmatpush1.msra.mxu1 %v371_v45 }
 0x106   : > { %561 = vmatmul.mubr.msk.f32.vlgmr.msra.gmra.mxu1 %vm389_vm1, %v375_v46 }
 0x107   : > { %466 = vmatprep.mubr.f32.mxu1 %v603_v0 }
 0x10a   : > { %562 = vmatmul.mubr.msk.f32.gmra.mxu1 %vm389_vm1, %v376_v47 }
 0x1c6   : > { %v462_v49 = vpop.f32.mrf.mxu1 }
 0x1c7   : > { %v463_v50 = vadd.f32 %v462_v49, %v382_v48 }
 0x1c8   : > { %v464_v51 = vpop.f32.mrf.mxu1 }
 0x1c9   : > { %473 = vst [vmem:[%s244_s17] sm:$0xff] %v463_v50  ;;  %v465_v52 = vadd.f32 %v464_v51, %v382_v48 }
 0x1ca   : > { %v468_v54 = vpop.f32.mrf.mxu1 }
 0x1cb   : > { %474 = vst [vmem:[%s244_s17 + $0x8] sm:$0xff] %v465_v52  ;;  %v469_v55 = vadd.f32 %v468_v54, %v387_v53 }
 0x1cc   : > { %v470_v56 = vpop.f32.mrf.mxu1 }
 0x1cd   : > { %475 = vst [vmem:[%s244_s17 + $0x10] sm:$0xff] %v469_v55  ;;  %v471_v57 = vadd.f32 %v470_v56, %v387_v53 }
 0x1cf   : > { %476 = vst [vmem:[%s244_s17 + $0x18] sm:$0xff] %v471_v57 }
 0x1d0 PF: > { %s15_s18 = sadd.s32 1, %s601_s18  }
 0x1d1   : > { %p12_p4 = scmp.ge.s32.totalorder %s15_s18, 4  }
 0x1d3   :  { %14 = sbr.rel (!%p12_p4) target bundleno = 1 (0x1), region = 73 }

// kernel: vae_decode_forward.7
= control target key start
LH: loop header
LB: loop body
LE: loop exit
PB: predicated region body
PF: predicated region fallthrough
CT: control target
= control target key end

     0   :  { %s1286_s18 = smov 0   ;;  %s1450_s0 = inlined_call_operand.vmem [shape: f32[2,16,1024], index: 0, kind: input, shape index: {}]   ;;  %s1451_s1 = inlined_call_operand.vmem [shape: f32[2,16,1024], index: 1, kind: input, shape index: {}]   ;;  %s1452_s2 = inlined_call_operand.vmem [shape: f32[16,16], index: 2, kind: input, shape index: {}]   ;;  %s1453_s3 = inlined_call_operand.vmem [shape: f32[3,16], index: 3, kind: input, shape index: {}]   ;;  %s1454_s4 = inlined_call_operand.vmem [shape: f32[3,1], index: 4, kind: input, shape index: {}]   ;;  %s1455_s5 = inlined_call_operand.vmem [shape: f32[2,3,1024], index: 5, kind: output, shape index: {}]  }
   0x1 LB: > { %s1119_s19 = sadd.s32 4294967295, %s1252_s18   ;;  %p1123_p0 = scmp.ge.s32.totalorder %s1252_s18, 1  ;;  %s1252_s18 = sphi %s1286_s18, %s15_s18  }
   0x2   : > { %p197_p1 = scmp.lt.s32.totalorder %s1252_s18, 3 }
   0x4   : > { %p198_p2 = pnand %p1123_p0, %p197_p1 }
   0x5   : > { %p230_p3 = scmp.lt.s32.totalorder (!%p198_p2), %s1119_s19, 1 }
   0x6   : > { %201 = sbr.rel (%p198_p2) target bundleno = 469 (0x1d5), region = 40 }
   0xb   : > { %v1254_v0 = vmov 0.0   ;;  %s1457_s19 = smov (!%p230_p3, %s1119_s19), 1  ;;  %v261_v9 = vld [vmem:[%s1452_s2] sm:$0xff]  ;;  %vm279_vm0 = vcmask 130048   ;;  %v262_v14 = vld [vmem:[%s1452_s2 + $0x8] sm:$0xff]  ;;  %v1255_v20 = vmov 0  }
   0xc   : > { %350 = vmatprep.mubr.f32.mxu0 %v1254_v0  ;;  %427 = vmatprep.mubr.f32.mxu1 %v1254_v0  ;;  %s1168_s20 = sshll.u32 %s1457_s19, 7  ;;  %v723_v19 = vld [vmem:[%s1454_s4] sm:$0x7]  ;;  %s1170_s10 = sshll.u32 %s1457_s19, 5 }
   0xd   : > { %s1304_s23 = scalar_lea.vmem %s1451_s1, %s1168_s20  ;;  %1181 = vset.pattern.permute.xlu0 %v1255_v20  ;;  %s1352_s7 = scalar_lea.vmem %s1450_s0, %s1168_s20 }
   0xe   : > { %v272_v1 = vld [vmem:[%s1304_s23 + $0x48] sm:$0xff]  ;;  %v274_v2 = vld [vmem:[%s1304_s23 + $0x58] sm:$0xff]  ;;  %v271_v3 = vld [vmem:[%s1304_s23 + $0x40] sm:$0xff]  ;;  %726 = vperm.xlu0 %1181, %v723_v19   ;;  %s244_s13 = scalar_lea.vmem %s1455_s5, %s1170_s10 }
   0xf   : > { %314 = vmatprep.subr.mxu0 %v272_v1  ;;  %391 = vmatprep.subr.mxu1 %v274_v2  ;;  %v273_v4 = vld [vmem:[%s1304_s23 + $0x50] sm:$0xff]  ;;  %v264_v5 = vld [vmem:[%s1304_s23 + $0x8] sm:$0xff]  ;;  %v266_v6 = vld [vmem:[%s1304_s23 + $0x18] sm:$0xff] }
  0x10   : > { %315 = vmatpush1.msra.mxu0 %v271_v3  ;;  %392 = vmatpush1.msra.mxu1 %v273_v4  ;;  %v263_v7 = vld [vmem:[%s1304_s23] sm:$0xff]  ;;  %v265_v8 = vld [vmem:[%s1304_s23 + $0x10] sm:$0xff]  ;;  %v276_v10 = vld [vmem:[%s1304_s23 + $0x68] sm:$0xff] }
  0x11   : > { %316 = vmatprep.subr.mxu0 %v264_v5  ;;  %393 = vmatprep.subr.mxu1 %v266_v6  ;;  %v278_v11 = vld [vmem:[%s1304_s23 + $0x78] sm:$0xff]  ;;  %v275_v12 = vld [vmem:[%s1304_s23 + $0x60] sm:$0xff]  ;;  %v277_v13 = vld [vmem:[%s1304_s23 + $0x70] sm:$0xff] }
  0x12   : > { %317 = vmatpush1.msra.mxu0 %v263_v7  ;;  %394 = vmatpush1.msra.mxu1 %v265_v8  ;;  %v268_v15 = vld [vmem:[%s1304_s23 + $0x28] sm:$0xff]  ;;  %v270_v16 = vld [vmem:[%s1304_s23 + $0x38] sm:$0xff]  ;;  %v267_v17 = vld [vmem:[%s1304_s23 + $0x20] sm:$0xff] }
  0x13   : > { %1130 = vmatmul.mubr.msk.f32.vlgmr.msra.gmra.mxu0 %vm279_vm0, %v261_v9  ;;  %1132 = vmatmul.mubr.msk.f32.vlgmr.msra.gmra.mxu1 %vm279_vm0, %v261_v9  ;;  %v269_v18 = vld [vmem:[%s1304_s23 + $0x30] sm:$0xff]  ;;  %v245_v21 = vld [vmem:[%s1352_s7] sm:$0xff]  ;;  %v246_v25 = vld [vmem:[%s1352_s7 + $0x8] sm:$0xff] }
  0x14   : > { %468 = vmatprep.subr.mxu0 %v276_v10  ;;  %545 = vmatprep.subr.mxu1 %v278_v11  ;;  %v247_v22 = vld [vmem:[%s1352_s7 + $0x10] sm:$0xff]  ;;  %v248_v26 = vld [vmem:[%s1352_s7 + $0x18] sm:$0xff]  ;;  %v253_v31 = vld [vmem:[%s1352_s7 + $0x40] sm:$0xff] }
  0x15   : > { %469 = vmatpush1.msra.mxu0 %v275_v12  ;;  %546 = vmatpush1.msra.mxu1 %v277_v13  ;;  %v255_v36 = vld [vmem:[%s1352_s7 + $0x50] sm:$0xff]  ;;  %v254_v39 = vld [vmem:[%s1352_s7 + $0x48] sm:$0xff]  ;;  %v256_v40 = vld [vmem:[%s1352_s7 + $0x58] sm:$0xff] }
  0x16   : > { %356 = vmatprep.mubr.f32.mxu0 %v1254_v0  ;;  %433 = vmatprep.mubr.f32.mxu1 %v1254_v0  ;;  %v249_v47 = vld [vmem:[%s1352_s7 + $0x20] sm:$0xff]  ;;  %v251_v51 = vld [vmem:[%s1352_s7 + $0x30] sm:$0xff]  ;;  %v250_v55 = vld [vmem:[%s1352_s7 + $0x28] sm:$0xff] }
  0x17   : > { %1131 = vmatmul.mubr.msk.f32.gmra.mxu0 %vm279_vm0, %v262_v14  ;;  %1133 = vmatmul.mubr.msk.f32.gmra.mxu1 %vm279_vm0, %v262_v14  ;;  %v252_v56 = vld [vmem:[%s1352_s7 + $0x38] sm:$0xff]  ;;  %v257_v63 = vld [vmem:[%s1352_s7 + $0x60] sm:$0xff]  ;;  %v259_v4 = vld [vmem:[%s1352_s7 + $0x70] sm:$0xff] }
  0x18   : > { %470 = vmatprep.subr.mxu0 %v268_v15  ;;  %547 = vmatprep.subr.mxu1 %v270_v16  ;;  %v258_v8 = vld [vmem:[%s1352_s7 + $0x68] sm:$0xff] }
  0x19   : > { %471 = vmatpush1.msra.mxu0 %v267_v17  ;;  %548 = vmatpush1.msra.mxu1 %v269_v18 }
  0x1a   : > { %504 = vmatprep.mubr.f32.mxu0 %v1254_v0  ;;  %581 = vmatprep.mubr.f32.mxu1 %v1254_v0 }
  0x1b   : > { %1134 = vmatmul.mubr.msk.f32.vlgmr.msra.gmra.mxu0 %vm279_vm0, %v261_v9  ;;  %1136 = vmatmul.mubr.msk.f32.vlgmr.msra.gmra.mxu1 %vm279_vm0, %v261_v9  ;;  %v260_v9 = vld [vmem:[%s1352_s7 + $0x78] sm:$0xff] }
  0x1c   : > { %510 = vmatprep.mubr.f32.mxu0 %v1254_v0  ;;  %587 = vmatprep.mubr.f32.mxu1 %v1254_v0 }
  0x1f   : > { %1135 = vmatmul.mubr.msk.f32.gmra.mxu0 %vm279_vm0, %v262_v14  ;;  %1137 = vmatmul.mubr.msk.f32.gmra.mxu1 %vm279_vm0, %v262_v14 }
  0x20   : > { %796 = vmatprep.mubr.f32.mxu0 %v1254_v0  ;;  %867 = vmatprep.mubr.f32.mxu1 %v1254_v0 }
  0xd3   : > { %v352_v23 = vpop.f32.mrf.mxu0  ;;  %v429_v24 = vpop.f32.mrf.mxu1 }
  0xd4   : > { %v1358_v27 = vadd.f32 %v352_v23, %v245_v21  ;;  %v1360_v28 = vadd.f32 %v429_v24, %v247_v22 }
  0xd5   : > { %v354_v29 = vpop.f32.mrf.mxu0  ;;  %v431_v30 = vpop.f32.mrf.mxu1 }
  0xd6   : > { %v1138_v32 = vmul.f32 -1.442695, %v1358_v27  ;;  %v1140_v33 = vmul.f32 -1.442695, %v1360_v28  ;;  %v1365_v34 = vadd.f32 %v354_v29, %v246_v25  ;;  %v1367_v35 = vadd.f32 %v431_v30, %v248_v26 }
  0xd7   : > { %v358_v37 = vpop.f32.mrf.mxu0  ;;  %v435_v38 = vpop.f32.mrf.mxu1 }
  0xd8   : > { %1182 = vpow2.f32 %v1138_v32  ;;  %v1139_v41 = vmul.f32 -1.442695, %v1365_v34  ;;  %v1141_v42 = vmul.f32 -1.442695, %v1367_v35  ;;  %v1374_v43 = vadd.f32 %v358_v37, %v253_v31 }
  0xd9   : > { %1184 = vpow2.f32 %v1140_v33  ;;  %v1376_v44 = vadd.f32 %v435_v38, %v255_v36  ;;  %v360_v45 = vpop.f32.mrf.mxu0  ;;  %v437_v46 = vpop.f32.mrf.mxu1 }
  0xda   : > { %1186 = vpow2.f32 %v1139_v41  ;;  %v1146_v48 = vmul.f32 -1.442695, %v1374_v43  ;;  %v1380_v49 = vadd.f32 %v360_v45, %v254_v39  ;;  %v1382_v50 = vadd.f32 %v437_v46, %v256_v40 }
  0xdb   : > { %1188 = vpow2.f32 %v1141_v42  ;;  %v1148_v52 = vmul.f32 -1.442695, %v1376_v44  ;;  %v506_v53 = vpop.f32.mrf.mxu0  ;;  %v583_v54 = vpop.f32.mrf.mxu1 }
  0xdc   : > { %1190 = vpow2.f32 %v1146_v48  ;;  %v1147_v57 = vmul.f32 -1.442695, %v1380_v49  ;;  %v1149_v58 = vmul.f32 -1.442695, %v1382_v50  ;;  %v1390_v59 = vadd.f32 %v506_v53, %v249_v47 }
  0xdd   : > { %1192 = vpow2.f32 %v1148_v52  ;;  %v1392_v60 = vadd.f32 %v583_v54, %v251_v51  ;;  %v508_v61 = vpop.f32.mrf.mxu0  ;;  %v585_v62 = vpop.f32.mrf.mxu1 }
  0xde   : > { %1194 = vpow2.f32 %v1147_v57  ;;  %v1142_v1 = vmul.f32 -1.442695, %v1390_v59  ;;  %v1396_v2 = vadd.f32 %v508_v61, %v250_v55  ;;  %v1398_v3 = vadd.f32 %v585_v62, %v252_v56 }
  0xdf   : > { %1196 = vpow2.f32 %v1149_v58  ;;  %v1144_v5 = vmul.f32 -1.442695, %v1392_v60  ;;  %v512_v6 = vpop.f32.mrf.mxu0  ;;  %v589_v7 = vpop.f32.mrf.mxu1 }
  0xe0   : > { %1198 = vpow2.f32 %v1142_v1  ;;  %v1143_v10 = vmul.f32 -1.442695, %v1396_v2  ;;  %v1145_v11 = vmul.f32 -1.442695, %v1398_v3  ;;  %v1406_v12 = vadd.f32 %v512_v6, %v257_v63 }
  0xe1   : > { %1200 = vpow2.f32 %v1144_v5  ;;  %v1408_v13 = vadd.f32 %v589_v7, %v259_v4  ;;  %v514_v14 = vpop.f32.mrf.mxu0  ;;  %v591_v15 = vpop.f32.mrf.mxu1 }
  0xe2   : > { %1202 = vpow2.f32 %v1143_v10  ;;  %v1150_v16 = vmul.f32 -1.442695, %v1406_v12  ;;  %v1411_v17 = vadd.f32 %v514_v14, %v258_v8  ;;  %v1413_v18 = vadd.f32 %v591_v15, %v260_v9 }
  0xe3   : > { %1204 = vpow2.f32 %v1145_v11  ;;  %v1152_v19 = vmul.f32 -1.442695, %v1408_v13 }
  0xe4   : > { %1206 = vpow2.f32 %v1150_v16  ;;  %v1151_v20 = vmul.f32 -1.442695, %v1411_v17  ;;  %v1153_v21 = vmul.f32 -1.442695, %v1413_v18 }
  0xe5   : > { %v1183_v22 = vpop.eup %1182  ;;  %1208 = vpow2.f32 %v1152_v19 }
  0xe6   : > { %v1185_v23 = vpop.eup %1184  ;;  %v658_v24 = vadd.f32 1.0, %v1183_v22  ;;  %1210 = vpow2.f32 %v1151_v20 }
  0xe7   : > { %v1187_v25 = vpop.eup %1186  ;;  %1212 = vpow2.f32 %v1153_v21  ;;  %v660_v39 = vadd.f32 1.0, %v1185_v23 }
  0xe8   : > { %v1189_v26 = vpop.eup %1188  ;;  %v659_v29 = vadd.f32 1.0, %v1187_v25  ;;  %1214 = vrcp.f32 %v658_v24 }
  0xe9   : > { %v1191_v30 = vpop.eup %1190  ;;  %v661_v31 = vadd.f32 1.0, %v1189_v26 }
  0xea   : > { %v1193_v32 = vpop.eup %1192  ;;  %1216 = vrcp.f32 %v659_v29  ;;  %v666_v33 = vadd.f32 1.0, %v1191_v30 }
  0xeb   : > { %v1195_v36 = vpop.eup %1194  ;;  %1218 = vrcp.f32 %v661_v31  ;;  %v668_v37 = vadd.f32 1.0, %v1193_v32 }
  0xec   : > { %v1197_v38 = vpop.eup %1196  ;;  %1220 = vrcp.f32 %v666_v33  ;;  %v667_v40 = vadd.f32 1.0, %v1195_v36 }
  0xed   : > { %v1199_v41 = vpop.eup %1198  ;;  %1222 = vrcp.f32 %v668_v37  ;;  %v669_v42 = vadd.f32 1.0, %v1197_v38 }
  0xee   : > { %v1201_v45 = vpop.eup %1200  ;;  %1224 = vrcp.f32 %v667_v40  ;;  %v662_v46 = vadd.f32 1.0, %v1199_v41 }
  0xef   : > { %v1203_v47 = vpop.eup %1202  ;;  %1226 = vrcp.f32 %v669_v42  ;;  %v664_v61 = vadd.f32 1.0, %v1201_v45 }
  0xf0   : > { %v1205_v48 = vpop.eup %1204  ;;  %1228 = vrcp.f32 %v660_v39  ;;  %v663_v51 = vadd.f32 1.0, %v1203_v47 }
  0xf1   : > { %v1207_v52 = vpop.eup %1206  ;;  %1230 = vrcp.f32 %v662_v46  ;;  %v665_v53 = vadd.f32 1.0, %v1205_v48 }
  0xf2   : > { %v1209_v54 = vpop.eup %1208  ;;  %1232 = vrcp.f32 %v663_v51  ;;  %v670_v55 = vadd.f32 1.0, %v1207_v52 }
  0xf3   : > { %v1211_v56 = vpop.eup %1210  ;;  %1234 = vrcp.f32 %v665_v53  ;;  %v672_v57 = vadd.f32 1.0, %v1209_v54 }
  0xf4   : > { %v1213_v58 = vpop.eup %1212  ;;  %1236 = vrcp.f32 %v670_v55  ;;  %v671_v62 = vadd.f32 1.0, %v1211_v56 }
  0xf5   : > { %1238 = vrcp.f32 %v672_v57  ;;  %v673_v63 = vadd.f32 1.0, %v1213_v58  ;;  %v1215_v1 = vpop.eup %1214 }
  0xf6   : > { %1240 = vrcp.f32 %v671_v62  ;;  %v706_v22 = vmul.f32 %v1215_v1, %v1358_v27 }
  0xf7   : > { %v1217_v4 = vpop.eup %1216  ;;  %1242 = vrcp.f32 %v673_v63 }
  0xf8   : > { %v1219_v5 = vpop.eup %1218  ;;  %1244 = vrcp.f32 %v664_v61  ;;  %v707_v19 = vmul.f32 %v1217_v4, %v1365_v34 }
  0xf9   : > { %v1221_v6 = vpop.eup %1220  ;;  %v709_v23 = vmul.f32 %v1219_v5, %v1367_v35 }
  0xfa   : > { %v1223_v7 = vpop.eup %1222  ;;  %v714_v14 = vmul.f32 %v1221_v6, %v1374_v43 }
  0xfb   : > { %v1225_v8 = vpop.eup %1224  ;;  %v716_v20 = vmul.f32 %v1223_v7, %v1376_v44 }
  0xfc   : > { %v1227_v9 = vpop.eup %1226  ;;  %v715_v10 = vmul.f32 %v1225_v8, %v1380_v49  ;;  %v722_v49 = vld [vmem:[%s1453_s3] sm:$0x7] }
  0xfd   : > { %v1229_v11 = vpop.eup %1228  ;;  %v717_v15 = vmul.f32 %v1227_v9, %v1382_v50 }
  0xfe   : > { %v1231_v16 = vpop.eup %1230  ;;  %760 = vmatprep.subr.mxu0 %v715_v10  ;;  %v708_v50 = vmul.f32 %v1229_v11, %v1360_v28 }
  0xff   : > { %v1233_v21 = vpop.eup %1232  ;;  %831 = vmatprep.subr.mxu1 %v717_v15  ;;  %761 = vmatpush1.msra.mxu0 %v714_v14  ;;  %v710_v31 = vmul.f32 %v1231_v16, %v1390_v59 }
 0x100   : > { %v1235_v43 = vpop.eup %1234  ;;  %832 = vmatpush1.msra.mxu1 %v716_v20  ;;  %762 = vmatprep.subr.mxu0 %v707_v19  ;;  %v711_v29 = vmul.f32 %v1233_v21, %v1396_v2 }
 0x101   : > { %v1237_v34 = vpop.eup %1236  ;;  %833 = vmatprep.subr.mxu1 %v709_v23  ;;  %763 = vmatpush1.msra.mxu0 %v706_v22  ;;  %v713_v32 = vmul.f32 %v1235_v43, %v1398_v3 }
 0x102   : > { %v1239_v44 = vpop.eup %1238  ;;  %834 = vmatpush1.msra.mxu1 %v708_v50  ;;  %1154 = vmatmul.mubr.msk.f32.vlgmr.msra.gmra.mxu0 %vm279_vm0, %v722_v49  ;;  %v718_v25 = vmul.f32 %v1237_v34, %v1406_v12 }
 0x103   : > { %v1241_v27 = vpop.eup %1240  ;;  %1155 = vmatmul.mubr.msk.f32.vlgmr.msra.gmra.mxu1 %vm279_vm0, %v722_v49  ;;  %938 = vmatprep.mubr.f32.mxu0 %v1254_v0  ;;  %v720_v30 = vmul.f32 %v1239_v44, %v1408_v13 }
 0x104   : > { %v1243_v35 = vpop.eup %1242  ;;  %v719_v24 = vmul.f32 %v1241_v27, %v1411_v17  ;;  %1009 = vmatprep.mubr.f32.mxu1 %v1254_v0  ;;  %v727_v0 = vpop.permute.xlu0 %726 }
 0x105   : > { %v1245_v28 = vpop.eup %1244  ;;  %v721_v26 = vmul.f32 %v1243_v35, %v1413_v18 }
 0x106   : > { %902 = vmatprep.subr.mxu0 %v719_v24  ;;  %v712_v17 = vmul.f32 %v1245_v28, %v1392_v60 }
 0x107   : > { %973 = vmatprep.subr.mxu1 %v721_v26  ;;  %903 = vmatpush1.msra.mxu0 %v718_v25 }
 0x108   : > { %974 = vmatpush1.msra.mxu1 %v720_v30  ;;  %904 = vmatprep.subr.mxu0 %v711_v29 }
 0x109   : > { %975 = vmatprep.subr.mxu1 %v713_v32  ;;  %905 = vmatpush1.msra.mxu0 %v710_v31 }
 0x10a   : > { %976 = vmatpush1.msra.mxu1 %v712_v17  ;;  %1156 = vmatmul.mubr.msk.f32.vlgmr.msra.gmra.mxu0 %vm279_vm0, %v722_v49 }
 0x10b   : > { %1157 = vmatmul.mubr.msk.f32.vlgmr.msra.gmra.mxu1 %vm279_vm0, %v722_v49 }
 0x1c2   : > { %v798_v2 = vpop.f32.mrf.mxu0 }
 0x1c3   : > { %v869_v12 = vpop.f32.mrf.mxu1  ;;  %v799_v59 = vadd.f32 %v798_v2, %v727_v0 }
 0x1c4   : > { %v800_v13 = vpop.f32.mrf.mxu0  ;;  %v870_v3 = vadd.f32 %v869_v12, %v727_v0 }
 0x1c5   : > { %v801_v18 = vadd.f32 %v800_v13, %v727_v0  ;;  %v1158_v33 = vclamps-f32 %v799_v59, 1.0  ;;  %v871_v36 = vpop.f32.mrf.mxu1 }
 0x1c6   : > { %v872_v60 = vadd.f32 %v871_v36, %v727_v0  ;;  %v1160_v37 = vclamps-f32 %v870_v3, 1.0 }
 0x1c7   : > { %v1159_v38 = vclamps-f32 %v801_v18, 1.0 }
 0x1c8   : > { %v1161_v39 = vclamps-f32 %v872_v60, 1.0 }
 0x1c9   : > { %v1040_v40 = vcombine.low %v1158_v33, %v1159_v38 }
 0x1ca   : > { %v1041_v41 = vcombine.low %v1160_v37, %v1161_v39  ;;  %v940_v42 = vpop.f32.mrf.mxu0 }
 0x1cb   : > { %1048 = vst [vmem:[%s244_s13] sm:$0x77] %v1040_v40  ;;  %v941_v45 = vadd.f32 %v940_v42, %v727_v0  ;;  %v1011_v46 = vpop.f32.mrf.mxu1 }
 0x1cc   : > { %1049 = vst [vmem:[%s244_s13 + $0x8] sm:$0x77] %v1041_v41  ;;  %v1012_v47 = vadd.f32 %v1011_v46, %v727_v0  ;;  %v942_v48 = vpop.f32.mrf.mxu0 }
 0x1cd   : > { %v943_v51 = vadd.f32 %v942_v48, %v727_v0  ;;  %v1013_v52 = vpop.f32.mrf.mxu1  ;;  %v1162_v54 = vclamps-f32 %v941_v45, 1.0 }
 0x1ce   : > { %v1014_v53 = vadd.f32 %v1013_v52, %v727_v0  ;;  %v1164_v56 = vclamps-f32 %v1012_v47, 1.0 }
 0x1cf   : > { %v1163_v55 = vclamps-f32 %v943_v51, 1.0 }
 0x1d0   : > { %v1165_v57 = vclamps-f32 %v1014_v53, 1.0 }
 0x1d1   : > { %v1042_v58 = vcombine.low %v1162_v54, %v1163_v55 }
 0x1d2   : > { %v1043_v61 = vcombine.low %v1164_v56, %v1165_v57 }
 0x1d3   : > { %1050 = vst [vmem:[%s244_s13 + $0x10] sm:$0x77] %v1042_v58 }
 0x1d4   : > { %1051 = vst [vmem:[%s244_s13 + $0x18] sm:$0x77] %v1043_v61 }
 0x1d5 PF: > { %s15_s18 = sadd.s32 1, %s1252_s18  }
 0x1d6   : > { %p12_p4 = scmp.ge.s32.totalorder %s15_s18, 4  }
 0x1d8   :  { %14 = sbr.rel (!%p12_p4) target bundleno = 1 (0x1), region = 73 }

</bundles_post_ra>
